<compile_context>
chip_gen: v6e
topology: v6e:2x2x1
jax: 0.10.0
libtpu: 0.0.40
codegen_flags: <defaults>
</compile_context>

<pallas_src>
import functools

import jax
import jax.numpy as jnp
from jax.experimental import pallas as pl
from jax.experimental.pallas import tpu as pltpu


def _round_up(x, m):
    return ((x + m - 1) // m) * m


def _mlp_head_kernel(x_ref, w1_ref, b1_ref, w2_ref, b2_ref, o_ref, *, out_dim):
    """Fused MLP head: relu(x @ W1 + b1) @ W2 + b2 for one batch tile."""
    # Cast matmul operands to bf16 in-kernel (no extra HBM pass in the wrapper).
    x = x_ref[...].astype(jnp.bfloat16)                                # (tb, 2D)
    w1 = w1_ref[...].astype(jnp.bfloat16)                              # (2D, H)
    h = jnp.dot(x, w1, preferred_element_type=jnp.float32)             # (tb, H) f32
    # Bias + ReLU in f32 on the VPU (bf16 VPU not available on v5e).
    h = jnp.maximum(h + b1_ref[...].astype(jnp.float32), 0.0)
    h = h.astype(jnp.bfloat16)
    w2 = w2_ref[...].astype(jnp.bfloat16)                              # (H, O_pad)
    y = jnp.dot(h, w2, preferred_element_type=jnp.float32)             # (tb, O_pad) f32
    y = y + b2_ref[...].astype(jnp.float32)
    # Store only the real output columns (unpadded, masked partial store is trivial).
    o_ref[...] = y[:, :out_dim].astype(o_ref.dtype)


def _device_vmem_ceiling_bytes():
    """Physical VMEM of the current device minus headroom (portable to v7x's 64 MiB)."""
    try:
        cap = int(pltpu.get_tpu_info().vmem_capacity_bytes)
    except Exception:
        cap = 64 * 1024 * 1024          # conservative: v7x per-TensorCore VMEM
    return max(16 * 1024 * 1024, cap - 16 * 1024 * 1024)


@functools.partial(jax.jit, static_argnames=("block_b_max",))
def classification_head_forward(x, w1, b1, w2, b2, *, block_b_max=512):
    """Forward pass of ClassificationHead.  block_b_max: upper bound on the batch tile."""
    B, in2 = x.shape
    H = w1.shape[1]
    O = w2.shape[1]

    b1 = jnp.reshape(b1, (1, H))
    b2 = jnp.reshape(b2, (1, O))

    # --- adaptive batch tiling -------------------------------------------------------------
    # 16-row minimum (bf16 sublane pack); >=2 tiles when possible so v7x megacore gets work.
    B_ru = _round_up(B, 16)
    n_tiles = max(1, -(-B_ru // block_b_max))
    if n_tiles == 1 and B_ru > 16:
        n_tiles = 2
    block_b = _round_up(-(-B_ru // n_tiles), 16)
    B_pad = block_b * n_tiles

    # --- lane-dense padding of W2/b2 only (output itself stays unpadded) --------------------
    O_pad = _round_up(O, 128)

    x_p = x if B_pad == B else jnp.pad(x, ((0, B_pad - B), (0, 0)))
    w2_p = w2 if O_pad == O else jnp.pad(w2, ((0, 0), (0, O_pad - O)))
    b2_p = b2 if O_pad == O else jnp.pad(b2, ((0, 0), (0, O_pad - O)))

    grid = (n_tiles,)

    # Advisory cost estimate for XLA scheduling around this custom call.
    flops = 2 * B_pad * (in2 * H + H * O_pad)
    bytes_accessed = (
        B_pad * in2 * x.dtype.itemsize
        + in2 * H * w1.dtype.itemsize
        + H * b1.dtype.itemsize
        + H * O_pad * w2.dtype.itemsize
        + O_pad * b2.dtype.itemsize
        + B_pad * O * x.dtype.itemsize
    )
    cost = pl.CostEstimate(flops=flops, transcendentals=0, bytes_accessed=bytes_accessed)

    # Explicit VMEM budget: double-buffered tiles/weights + in-kernel intermediates, headroom,
    # clamped to the actual device capacity (v7x: 64 MiB per TensorCore).
    f32b = 4
    vmem_needed = (
        2 * block_b * in2 * x.dtype.itemsize        # x tiles (double-buffered)
        + 2 * in2 * H * w1.dtype.itemsize           # W1
        + 2 * 8 * H * f32b                          # b1 (sublane-padded)
        + 2 * H * O_pad * w2.dtype.itemsize         # W2 (lane-padded)
        + 2 * 8 * O_pad * f32b                      # b2
        + 2 * block_b * 128 * x.dtype.itemsize      # out tiles (lane-padded in VMEM)
        + block_b * in2 * 2 + in2 * H * 2           # bf16 copies of x, W1
        + block_b * H * (f32b + 2)                  # h in f32 + bf16
        + H * O_pad * 2                             # bf16 W2
        + block_b * O_pad * f32b                    # y (f32)
    )
    vmem_limit = int(
        min(_device_vmem_ceiling_bytes(), max(2 * vmem_needed, 16 * 1024 * 1024))
    )

    out = pl.pallas_call(
        functools.partial(_mlp_head_kernel, out_dim=O),
        out_shape=jax.ShapeDtypeStruct((B_pad, O), x.dtype),
        grid_spec=pl.GridSpec(
            grid=grid,
            in_specs=[
                pl.BlockSpec((block_b, in2), lambda i: (i, 0)),   # x tile
                pl.BlockSpec((in2, H), lambda i: (0, 0)),         # W1 (resident)
                pl.BlockSpec((1, H), lambda i: (0, 0)),           # b1
                pl.BlockSpec((H, O_pad), lambda i: (0, 0)),       # W2 (resident, lane-padded)
                pl.BlockSpec((1, O_pad), lambda i: (0, 0)),       # b2
            ],
            out_specs=pl.BlockSpec((block_b, O), lambda i: (i, 0)),
        ),
        compiler_params=pltpu.CompilerParams(
            dimension_semantics=("parallel",),   # batch tiles split across TCs (v7x megacore)
            vmem_limit_bytes=vmem_limit,
        ),
        cost_estimate=cost,
    )(x_p, w1, b1, w2_p, b2_p)

    # Strip batch padding (padded rows compute relu(b1)@W2+b2 garbage and are discarded here).
    return out[:B]


def _reference(x, w1, b1, w2, b2):
    h = jnp.maximum(x @ w1 + b1, 0.0)
    return h @ w2 + b2


if __name__ == "__main__":
    # Small shapes consistent with the module:
    #   input_dim = 64  -> forward input feature size is 2*input_dim = 128
    #   hidden_dim = 256 (module default is 1024; shrunk for a small test)
    #   output_dim = 2
    batch = 8
    input_dim = 64
    hidden_dim = 256
    output_dim = 2

    key = jax.random.PRNGKey(0)
    kx, k1, k2, k3, k4 = jax.random.split(key, 5)

    x = jax.random.normal(kx, (batch, 2 * input_dim), dtype=jnp.float32)

    # Deterministic parameter init (Linear-like scaling).
    fan_in1 = 2 * input_dim
    w1 = jax.random.uniform(k1, (2 * input_dim, hidden_dim), jnp.float32,
                            minval=-1.0, maxval=1.0) / jnp.sqrt(fan_in1)
    b1 = jax.random.uniform(k2, (1, hidden_dim), jnp.float32,
                            minval=-1.0, maxval=1.0) / jnp.sqrt(fan_in1)
    fan_in2 = hidden_dim
    w2 = jax.random.uniform(k3, (hidden_dim, output_dim), jnp.float32,
                            minval=-1.0, maxval=1.0) / jnp.sqrt(fan_in2)
    b2 = jax.random.uniform(k4, (1, output_dim), jnp.float32,
                            minval=-1.0, maxval=1.0) / jnp.sqrt(fan_in2)

    out = classification_head_forward(x, w1, b1, w2, b2)
    out = jax.block_until_ready(out)

    ref = _reference(x, w1, b1, w2, b2)
    assert out.shape == (batch, output_dim)
    # Loosened tolerance: matmul operands are bf16 (f32 accumulation), reference is full f32.
    assert jnp.allclose(out, ref, atol=5e-2, rtol=5e-2), "mismatch vs reference"

    print("KERNEL_OK")
</pallas_src>

<mosaic_0001>
module attributes {stable_mosaic.version = 11 : i64} {
  func.func @_mlp_head_kernel(%arg0: i32, %arg1: memref<16x128xf32, #tpu.memory_space<vmem>>, %arg2: memref<128x256xf32, #tpu.memory_space<vmem>>, %arg3: memref<1x256xf32, #tpu.memory_space<vmem>>, %arg4: memref<256x128xf32, #tpu.memory_space<vmem>>, %arg5: memref<1x128xf32, #tpu.memory_space<vmem>>, %arg6: memref<16x2xf32, #tpu.memory_space<vmem>>) attributes {dimension_semantics = [#tpu.dimension_semantics<parallel>], iteration_bounds = array<i64: 1>, scalar_prefetch = 0 : i64, scratch_operands = 0 : i64, tpu.core_type = #tpu.core_type<tc>, window_params = [{transform_indices = @transform_0, window_bounds = array<i64: 16, 128>}, {pipeline_mode = #tpu.pipeline_mode<synchronous>, transform_indices = @transform_1, window_bounds = array<i64: 128, 256>}, {pipeline_mode = #tpu.pipeline_mode<synchronous>, transform_indices = @transform_2, window_bounds = array<i64: 1, 256>}, {pipeline_mode = #tpu.pipeline_mode<synchronous>, transform_indices = @transform_3, window_bounds = array<i64: 256, 128>}, {pipeline_mode = #tpu.pipeline_mode<synchronous>, transform_indices = @transform_4, window_bounds = array<i64: 1, 128>}, {transform_indices = @transform_5, window_bounds = array<i64: 16, 2>}]} {
    %c0 = arith.constant 0 : index
    %c0_0 = arith.constant 0 : index
    %0 = vector.load %arg1[%c0, %c0_0] : memref<16x128xf32, #tpu.memory_space<vmem>>, vector<16x128xf32>
    %1 = arith.truncf %0 : vector<16x128xf32> to vector<16x128xbf16>
    %c0_1 = arith.constant 0 : index
    %c0_2 = arith.constant 0 : index
    %2 = vector.load %arg2[%c0_1, %c0_2] : memref<128x256xf32, #tpu.memory_space<vmem>>, vector<128x256xf32>
    %3 = arith.truncf %2 : vector<128x256xf32> to vector<128x256xbf16>
    %cst = arith.constant dense<0.000000e+00> : vector<16x256xf32>
    %4 = tpu.matmul %1, %3, %cst {dimension_numbers = #tpu.dot_dimension_numbers<[1], [0], [0], [1], [0, 0, 1, 1], [], []>} : vector<16x128xbf16>, vector<128x256xbf16>, vector<16x256xf32> -> vector<16x256xf32>
    %c0_3 = arith.constant 0 : index
    %c0_4 = arith.constant 0 : index
    %5 = vector.load %arg3[%c0_3, %c0_4] : memref<1x256xf32, #tpu.memory_space<vmem>>, vector<1x256xf32>
    %6 = vector.broadcast %5 : vector<1x256xf32> to vector<16x256xf32>
    %7 = arith.addf %4, %6 : vector<16x256xf32>
    %cst_5 = arith.constant 0.000000e+00 : f32
    %8 = vector.broadcast %cst_5 : f32 to vector<16x256xf32>
    %9 = arith.maximumf %7, %8 : vector<16x256xf32>
    %10 = arith.truncf %9 : vector<16x256xf32> to vector<16x256xbf16>
    %c0_6 = arith.constant 0 : index
    %c0_7 = arith.constant 0 : index
    %11 = vector.load %arg4[%c0_6, %c0_7] : memref<256x128xf32, #tpu.memory_space<vmem>>, vector<256x128xf32>
    %12 = arith.truncf %11 : vector<256x128xf32> to vector<256x128xbf16>
    %cst_8 = arith.constant dense<0.000000e+00> : vector<16x128xf32>
    %13 = tpu.matmul %10, %12, %cst_8 {dimension_numbers = #tpu.dot_dimension_numbers<[1], [0], [0], [1], [0, 0, 1, 1], [], []>} : vector<16x256xbf16>, vector<256x128xbf16>, vector<16x128xf32> -> vector<16x128xf32>
    %c0_9 = arith.constant 0 : index
    %c0_10 = arith.constant 0 : index
    %14 = vector.load %arg5[%c0_9, %c0_10] : memref<1x128xf32, #tpu.memory_space<vmem>>, vector<1x128xf32>
    %15 = vector.broadcast %14 : vector<1x128xf32> to vector<16x128xf32>
    %16 = arith.addf %13, %15 : vector<16x128xf32>
    %17 = vector.extract_strided_slice %16 {offsets = [0, 0], sizes = [16, 2], strides = [1, 1]} : vector<16x128xf32> to vector<16x2xf32>
    %c0_11 = arith.constant 0 : index
    %c0_12 = arith.constant 0 : index
    %18 = vector.load %arg6[%c0_11, %c0_12] : memref<16x2xf32, #tpu.memory_space<vmem>>, vector<16x2xf32>
    tpu.vector_store %arg6[%c0_11, %c0_12], %17 {strides = array<i32>} : memref<16x2xf32, #tpu.memory_space<vmem>>, vector<16x2xf32>,
    return
  }
  func.func @transform_0(%arg0: i32) -> (i32, i32) {
    %c0_i32 = arith.constant 0 : i32
    %c0_i32_0 = arith.constant 0 : i32
    return %arg0, %c0_i32 : i32, i32
  }
  func.func @transform_1(%arg0: i32) -> (i32, i32) {
    %c0_i32 = arith.constant 0 : i32
    %c0_i32_0 = arith.constant 0 : i32
    %c0_i32_1 = arith.constant 0 : i32
    return %c0_i32, %c0_i32_0 : i32, i32
  }
  func.func @transform_2(%arg0: i32) -> (i32, i32) {
    %c0_i32 = arith.constant 0 : i32
    %c0_i32_0 = arith.constant 0 : i32
    %c0_i32_1 = arith.constant 0 : i32
    return %c0_i32, %c0_i32_0 : i32, i32
  }
  func.func @transform_3(%arg0: i32) -> (i32, i32) {
    %c0_i32 = arith.constant 0 : i32
    %c0_i32_0 = arith.constant 0 : i32
    %c0_i32_1 = arith.constant 0 : i32
    return %c0_i32, %c0_i32_0 : i32, i32
  }
  func.func @transform_4(%arg0: i32) -> (i32, i32) {
    %c0_i32 = arith.constant 0 : i32
    %c0_i32_0 = arith.constant 0 : i32
    %c0_i32_1 = arith.constant 0 : i32
    return %c0_i32, %c0_i32_0 : i32, i32
  }
  func.func @transform_5(%arg0: i32) -> (i32, i32) {
    %c0_i32 = arith.constant 0 : i32
    %c0_i32_0 = arith.constant 0 : i32
    return %arg0, %c0_i32 : i32, i32
  }
}

</mosaic_0001>

<bundles_post_ra>
// kernel: classification_head_forward.1
= control target key start
LH: loop header
LB: loop body
LE: loop exit
PB: predicated region body
PF: predicated region fallthrough
CT: control target
= control target key end

     0   :  { %v260_v3 = vmov 0   ;;  %vm229_vm0 = vcmask 15360   ;;  %s501_s1 = inlined_call_operand.vmem [shape: f32[128,256], index: 1, kind: input, shape index: {}]   ;;  %s502_s3 = inlined_call_operand.vmem [shape: f32[256,128], index: 3, kind: input, shape index: {}]   ;;  %s503_s0 = inlined_call_operand.vmem [shape: f32[16,128], index: 0, kind: input, shape index: {}]   ;;  %s504_s2 = inlined_call_operand.vmem [shape: f32[1,256], index: 2, kind: input, shape index: {}]   ;;  %s505_s4 = inlined_call_operand.vmem [shape: f32[1,128], index: 4, kind: input, shape index: {}]   ;;  %s506_s5 = inlined_call_operand.vmem [shape: f32[16,2], index: 5, kind: output, shape index: {}]  }
   0x1   :  { %v53_v0 = vld [vmem:[%s501_s1 + $0xe8] sm:$0xff]  ;;  %v55_v1 = vld [vmem:[%s501_s1 + $0xf8] sm:$0xff]  ;;  %v52_v2 = vld [vmem:[%s501_s1 + $0xe0] sm:$0xff]  ;;  %116 = vmatprep.mubr.bf16.mxu0 %v260_v3 }
   0x2   :  { %v71_v4 = vpack.c.bf16 %v55_v1, %v53_v0  ;;  %v54_v5 = vld [vmem:[%s501_s1 + $0xf0] sm:$0xff]  ;;  %v49_v6 = vld [vmem:[%s501_s1 + $0xc8] sm:$0xff]  ;;  %v51_v7 = vld [vmem:[%s501_s1 + $0xd8] sm:$0xff] }
   0x3   :  { %v70_v8 = vpack.c.bf16 %v54_v5, %v52_v2  ;;  %v69_v9 = vpack.c.bf16 %v51_v7, %v49_v6  ;;  %v48_v10 = vld [vmem:[%s501_s1 + $0xc0] sm:$0xff]  ;;  %v50_v11 = vld [vmem:[%s501_s1 + $0xd0] sm:$0xff]  ;;  %v45_v12 = vld [vmem:[%s501_s1 + $0xa8] sm:$0xff] }
   0x4   :  { %84 = vmatprep.subr.bf16.mxu0 %v71_v4  ;;  %v47_v13 = vld [vmem:[%s501_s1 + $0xb8] sm:$0xff]  ;;  %v68_v14 = vpack.c.bf16 %v50_v11, %v48_v10  ;;  %v44_v16 = vld [vmem:[%s501_s1 + $0xa0] sm:$0xff]  ;;  %v46_v17 = vld [vmem:[%s501_s1 + $0xb0] sm:$0xff] }
   0x5   :  { %85 = vmatpush1.bf16.msra.mxu0 %v70_v8  ;;  %v67_v15 = vpack.c.bf16 %v47_v13, %v45_v12  ;;  %v41_v18 = vld [vmem:[%s501_s1 + $0x88] sm:$0xff]  ;;  %v43_v19 = vld [vmem:[%s501_s1 + $0x98] sm:$0xff]  ;;  %v66_v20 = vpack.c.bf16 %v46_v17, %v44_v16  ;;  %v40_v22 = vld [vmem:[%s501_s1 + $0x80] sm:$0xff] }
   0x6   :  { %86 = vmatprep.subr.bf16.mxu0 %v69_v9  ;;  %v65_v21 = vpack.c.bf16 %v43_v19, %v41_v18  ;;  %v42_v23 = vld [vmem:[%s501_s1 + $0x90] sm:$0xff]  ;;  %v37_v24 = vld [vmem:[%s501_s1 + $0x68] sm:$0xff]  ;;  %v39_v25 = vld [vmem:[%s501_s1 + $0x78] sm:$0xff] }
   0x7   :  { %v36_v26 = vld [vmem:[%s501_s1 + $0x60] sm:$0xff]  ;;  %v38_v27 = vld [vmem:[%s501_s1 + $0x70] sm:$0xff]  ;;  %v164_v29 = vld [vmem:[%s502_s3 + $0xf8] sm:$0xff]  ;;  %v64_v30 = vpack.c.bf16 %v42_v23, %v40_v22  ;;  %v63_v36 = vpack.c.bf16 %v39_v25, %v37_v24 }
   0x8   :  { %v163_v28 = vld [vmem:[%s502_s3 + $0xf0] sm:$0xff]  ;;  %v33_v31 = vld [vmem:[%s501_s1 + $0x48] sm:$0xff]  ;;  %v148_v34 = vld [vmem:[%s502_s3 + $0x78] sm:$0xff]  ;;  %v62_v46 = vpack.c.bf16 %v38_v27, %v36_v26 }
   0x9   :  { %87 = vmatpush1.bf16.msra.mxu0 %v68_v14  ;;  %v180_v32 = vpack.c.bf16 %v164_v29, %v163_v28  ;;  %v147_v33 = vld [vmem:[%s502_s3 + $0x70] sm:$0xff]  ;;  %v161_v35 = vld [vmem:[%s502_s3 + $0xe0] sm:$0xff]  ;;  %v162_v38 = vld [vmem:[%s502_s3 + $0xe8] sm:$0xff] }
   0xa   :  { %88 = vmatprep.subr.bf16.mxu0 %v67_v15  ;;  %v172_v37 = vpack.c.bf16 %v148_v34, %v147_v33  ;;  %v145_v39 = vld [vmem:[%s502_s3 + $0x60] sm:$0xff]  ;;  %v146_v40 = vld [vmem:[%s502_s3 + $0x68] sm:$0xff]  ;;  %v35_v41 = vld [vmem:[%s501_s1 + $0x58] sm:$0xff]  ;;  %v179_v42 = vpack.c.bf16 %v162_v38, %v161_v35 }
   0xb   :  { %237 = vmatprep.subr.bf16.mxu1 %v180_v32  ;;  %v159_v43 = vld [vmem:[%s502_s3 + $0xd0] sm:$0xff]  ;;  %v160_v44 = vld [vmem:[%s502_s3 + $0xd8] sm:$0xff]  ;;  %v171_v45 = vpack.c.bf16 %v146_v40, %v145_v39  ;;  %v32_v47 = vld [vmem:[%s501_s1 + $0x40] sm:$0xff]  ;;  %v61_v51 = vpack.c.bf16 %v35_v41, %v33_v31 }
   0xc   :  { %238 = vmatpush3.bf16.msra.mxu1 %v172_v37  ;;  %v178_v48 = vpack.c.bf16 %v160_v44, %v159_v43  ;;  %v143_v49 = vld [vmem:[%s502_s3 + $0x50] sm:$0xff]  ;;  %v144_v50 = vld [vmem:[%s502_s3 + $0x58] sm:$0xff]  ;;  %v157_v53 = vld [vmem:[%s502_s3 + $0xc0] sm:$0xff] }
   0xd   :  { %89 = vmatpush1.bf16.msra.mxu0 %v66_v20  ;;  %239 = vmatprep.subr.bf16.mxu1 %v179_v42  ;;  %v34_v52 = vld [vmem:[%s501_s1 + $0x50] sm:$0xff]  ;;  %v158_v54 = vld [vmem:[%s502_s3 + $0xc8] sm:$0xff]  ;;  %v31_v56 = vld [vmem:[%s501_s1 + $0x38] sm:$0xff]  ;;  %v170_v57 = vpack.c.bf16 %v144_v50, %v143_v49 }
   0xe   :  { %90 = vmatprep.subr.bf16.mxu0 %v65_v21  ;;  %v29_v55 = vld [vmem:[%s501_s1 + $0x28] sm:$0xff]  ;;  %v60_v58 = vpack.c.bf16 %v34_v52, %v32_v47  ;;  %v28_v59 = vld [vmem:[%s501_s1 + $0x20] sm:$0xff]  ;;  %v177_v60 = vpack.c.bf16 %v158_v54, %v157_v53  ;;  %v30_v0 = vld [vmem:[%s501_s1 + $0x30] sm:$0xff] }
   0xf   :  { %v141_v61 = vld [vmem:[%s502_s3 + $0x40] sm:$0xff]  ;;  %v142_v62 = vld [vmem:[%s502_s3 + $0x48] sm:$0xff]  ;;  %v59_v63 = vpack.c.bf16 %v31_v56, %v29_v55  ;;  %v155_v1 = vld [vmem:[%s502_s3 + $0xb0] sm:$0xff]  ;;  %v58_v6 = vpack.c.bf16 %v30_v0, %v28_v59 }
  0x10   :  { %240 = vmatpush3.bf16.msra.mxu1 %v171_v45  ;;  %v156_v2 = vld [vmem:[%s502_s3 + $0xb8] sm:$0xff]  ;;  %v25_v3 = vld [vmem:[%s501_s1 + $0x8] sm:$0xff]  ;;  %v169_v5 = vpack.c.bf16 %v142_v62, %v141_v61  ;;  %v139_v8 = vld [vmem:[%s502_s3 + $0x30] sm:$0xff] }
  0x11   :  { %91 = vmatpush1.bf16.msra.mxu0 %v64_v30  ;;  %241 = vmatprep.subr.bf16.mxu1 %v178_v48  ;;  %v27_v4 = vld [vmem:[%s501_s1 + $0x18] sm:$0xff]  ;;  %v176_v7 = vpack.c.bf16 %v156_v2, %v155_v1  ;;  %v24_v11 = vld [vmem:[%s501_s1] sm:$0xff]  ;;  %v26_v12 = vld [vmem:[%s501_s1 + $0x10] sm:$0xff] }
  0x12   :  { %92 = vmatprep.subr.bf16.mxu0 %v63_v36  ;;  %v140_v9 = vld [vmem:[%s502_s3 + $0x38] sm:$0xff]  ;;  %v57_v10 = vpack.c.bf16 %v27_v4, %v25_v3  ;;  %v56_v14 = vpack.c.bf16 %v26_v12, %v24_v11  ;;  %v21_v15 = vld [vmem:[%s503_s0] sm:$0xff]  ;;  %v22_v16 = vld [vmem:[%s503_s0 + $0x8] sm:$0xff]  ;;  %v74_v36 = vlaneseq }
  0x13   :  { %v168_v13 = vpack.c.bf16 %v140_v9, %v139_v8  ;;  %v23_v17 = vpack.c.bf16 %v22_v16, %v21_v15  ;;  %v153_v18 = vld [vmem:[%s502_s3 + $0xa0] sm:$0xff]  ;;  %v154_v19 = vld [vmem:[%s502_s3 + $0xa8] sm:$0xff]  ;;  %v151_v24 = vld [vmem:[%s502_s3 + $0x90] sm:$0xff] }
  0x14   :  { %242 = vmatpush3.bf16.msra.mxu1 %v170_v57  ;;  %v175_v20 = vpack.c.bf16 %v154_v19, %v153_v18  ;;  %v137_v21 = vld [vmem:[%s502_s3 + $0x20] sm:$0xff]  ;;  %v138_v22 = vld [vmem:[%s502_s3 + $0x28] sm:$0xff]  ;;  %v152_v25 = vld [vmem:[%s502_s3 + $0x98] sm:$0xff]  ;;  %v75_v37 = vshrl.u32 %v74_v36, 7 }
  0x15   :  { %93 = vmatpush1.bf16.msra.mxu0 %v62_v46  ;;  %243 = vmatprep.subr.bf16.mxu1 %v177_v60  ;;  %v167_v23 = vpack.c.bf16 %v138_v22, %v137_v21  ;;  %v174_v26 = vpack.c.bf16 %v152_v25, %v151_v24  ;;  %v135_v27 = vld [vmem:[%s502_s3 + $0x10] sm:$0xff]  ;;  %v136_v28 = vld [vmem:[%s502_s3 + $0x18] sm:$0xff]  ;;  %v149_v30 = vld [vmem:[%s502_s3 + $0x80] sm:$0xff] }
  0x16   :  { %94 = vmatprep.subr.bf16.mxu0 %v61_v51  ;;  %v166_v29 = vpack.c.bf16 %v136_v28, %v135_v27  ;;  %v150_v31 = vld [vmem:[%s502_s3 + $0x88] sm:$0xff]  ;;  %v133_v33 = vld [vmem:[%s502_s3] sm:$0xff]  ;;  %v80_v38 = vsub.s32 1, %v75_v37  ;;  %v76_v39 = vsub.s32 0, %v75_v37 }
  0x17   :  { %v173_v32 = vpack.c.bf16 %v150_v31, %v149_v30  ;;  %v134_v34 = vld [vmem:[%s502_s3 + $0x8] sm:$0xff]  ;;  %v72_v40 = vld [vmem:[%s504_s2] sm:$0x3] }
  0x18   :  { %244 = vmatpush3.bf16.msra.mxu1 %v169_v5  ;;  %v165_v35 = vpack.c.bf16 %v134_v34, %v133_v33  ;;  %v81_v42 = vrot.slane %v72_v40, %v80_v38  ;;  %v77_v43 = vrot.slane %v72_v40, %v76_v39 }
  0x19   :  { %95 = vmatpush1.bf16.msra.mxu0 %v60_v58  ;;  %245 = vmatprep.subr.bf16.mxu1 %v176_v7  ;;  %v236_v58 = vld [vmem:[%s505_s4] ss:$0 sm:$0xff] }
  0x1a   :  { %96 = vmatprep.subr.bf16.mxu0 %v59_v63 }
  0x1c   :  { %246 = vmatpush3.bf16.msra.mxu1 %v168_v13 }
  0x1d   :  { %97 = vmatpush1.bf16.msra.mxu0 %v58_v6  ;;  %247 = vmatprep.subr.bf16.mxu1 %v175_v20 }
  0x1e   :  { %98 = vmatprep.subr.bf16.mxu0 %v57_v10 }
  0x20   :  { %248 = vmatpush3.bf16.msra.mxu1 %v167_v23 }
  0x21   :  { %99 = vmatpush1.bf16.msra.mxu0 %v56_v14  ;;  %249 = vmatprep.subr.bf16.mxu1 %v174_v26 }
  0x24   :  { %117 = vmatmul.mubr.bf16.vlgmr.msra.gmra.mxu0 %v23_v17  ;;  %250 = vmatpush3.bf16.msra.mxu1 %v166_v29 }
  0x25   :  { %251 = vmatprep.subr.bf16.mxu1 %v173_v32 }
  0x28   :  { %252 = vmatpush3.bf16.msra.mxu1 %v165_v35 }
  0xe4   :  { %v118_v41 = vpop.f32.mrf.mxu0 }
  0xe5   :  { %v119_v48 = vadd.f32 %v118_v41, %v77_v43 }
  0xe6   :  { %v120_v44 = vpop.f32.mrf.mxu0 }
  0xe7   :  { %v121_v46 = vadd.f32 %v120_v44, %v81_v42  ;;  %v127_v54 = vmax.f32 %v119_v48, 0.0 }
  0xe8   :  { %v122_v45 = vpop.f32.mrf.mxu0 }
  0xe9   :  { %v123_v47 = vadd.f32 %v122_v45, %v77_v43  ;;  %v128_v52 = vmax.f32 %v121_v46, 0.0 }
  0xea   :  { %v124_v49 = vpop.f32.mrf.mxu0 }
  0xeb   :  { %v125_v50 = vadd.f32 %v124_v49, %v81_v42  ;;  %v129_v51 = vmax.f32 %v123_v47, 0.0 }
  0xed   :  { %v130_v53 = vmax.f32 %v125_v50, 0.0  ;;  %v131_v56 = vpack.c.bf16 %v129_v51, %v127_v54 }
  0xef   :  { %v132_v55 = vpack.c.bf16 %v130_v53, %v128_v52 }
  0xf1   :  { %220 = vmatprep.mubr.bf16.mxu1 %v132_v55 }
  0xf2   :  { %221 = vmatmul.mubr.bf16.vlgmr.msra.gmra.mxu1 %v131_v56 }
 0x1b2   :  { %v253_v57 = vpop.f32.mrf.mxu1 }
 0x1b4   :  { %v254_v59 = vpop.f32.mrf.mxu1 }
 0x1b5   :  { %v255_v60 = vadd.f32 %v254_v59, %v253_v57 }
 0x1b6   :  { %v256_v61 = vpop.f32.mrf.mxu1 }
 0x1b7   :  { %v223_v62 = vadd.f32 %v255_v60, %v236_v58 }
 0x1b8   :  { %v257_v63 = vpop.f32.mrf.mxu1 }
 0x1b9   :  { %230 = vst.msk [vmem:[%s506_s5] sm:$0xff] %vm229_vm0, %v223_v62  ;;  %v258_v0 = vadd.f32 %v257_v63, %v256_v61 }
 0x1bb   :  { %v226_v1 = vadd.f32 %v258_v0, %v236_v58 }
 0x1bd   :  { %231 = vst.msk [vmem:[%s506_s5 + $0x8] sm:$0xff] %vm229_vm0, %v226_v1 }

</bundles_post_ra>
